<compile_context>
chip_gen: v5e
topology: v5e:2x2
jax: 0.10.0
libtpu: 0.0.40
codegen_flags: <defaults>
</compile_context>

<pallas_src>
import functools

import jax
import jax.numpy as jnp
import numpy as np
from jax.experimental import pallas as pl
from jax.experimental.pallas import tpu as pltpu


def fin_kernel(x_ref, wpair_ref, wlin_ref, b_ref, o_ref):
    # x_ref:     (N, B_TILE) f32  -- batch on the lane axis
    # wpair_ref: (N, N)      f32  -- zero outside strict upper triangle (folded weights)
    # wlin_ref:  (N, 1)      f32  -- linear fc weights
    # b_ref:     (1,)        f32  -- bias, SMEM scalar
    # o_ref:     (1, B_TILE) f32  -- lane-dense output slab
    x = x_ref[...]                                                      # (N, BT)
    # pairwise quadratic form: t_i = sum_{j>i} w_pair[i,j] * x[j,:]
    t = jnp.dot(wpair_ref[...], x, preferred_element_type=jnp.float32)  # (N, BT)
    # fold the linear term in (lane-broadcast of the (N,1) weight column)
    t = t + wlin_ref[...]                                               # (N, BT)
    # out = sum_i x_i * (t_i + w_lin_i) + b  -> sublane reduce to (1, BT)
    o_ref[...] = jnp.sum(x * t, axis=0, keepdims=True) + b_ref[0]


def _round_up(v, m):
    return ((v + m - 1) // m) * m


def prepare_params(interaction_weight, fc_w, fc_b):
    """One-time weight folding (hoisted off the per-batch critical path)."""
    N = interaction_weight.shape[0]
    iu, ju = np.triu_indices(N, k=1)                       # static host-side indices
    fc_pair = fc_w[0, N:].astype(jnp.float32)              # (N*(N-1)//2,)
    w_pair = jnp.zeros((N, N), jnp.float32).at[iu, ju].set(
        interaction_weight[iu, ju].astype(jnp.float32) * fc_pair)  # strict upper tri
    w_lin = fc_w[0, :N].reshape(N, 1).astype(jnp.float32)
    bias = fc_b.reshape(1).astype(jnp.float32)
    return w_pair, w_lin, bias


@functools.partial(jax.jit, static_argnames=("b_tile",))
def _fin_forward(x, w_pair, w_lin, bias, *, b_tile=512):
    B, N = x.shape

    # Lane-dense batch tile: multiple of 128, no bigger than the 128-rounded batch.
    bt = min(int(b_tile), _round_up(B, 128))
    bt = max(128, _round_up(bt, 128))
    B_pad = _round_up(B, bt)

    # Batch-on-lanes layout: (N, B_pad); padded tail columns are zero (their outputs,
    # which equal the bias, are sliced away below).
    xt = jnp.zeros((N, B_pad), jnp.float32).at[:, :B].set(x.T.astype(jnp.float32))

    grid = (B_pad // bt,)
    out = pl.pallas_call(
        fin_kernel,
        out_shape=jax.ShapeDtypeStruct((1, B_pad), jnp.float32),
        grid_spec=pltpu.PrefetchScalarGridSpec(
            num_scalar_prefetch=0,
            grid=grid,
            in_specs=[
                pl.BlockSpec((N, bt), lambda i: (0, i)),            # x tile, batch on lanes
                pl.BlockSpec((N, N), lambda i: (0, 0)),             # folded pair weights
                pl.BlockSpec((N, 1), lambda i: (0, 0)),             # linear weights
                pl.BlockSpec(memory_space=pltpu.MemorySpace.SMEM),  # bias scalar
            ],
            out_specs=pl.BlockSpec((1, bt), lambda i: (0, i)),      # lane-dense output slab
        ),
        compiler_params=pltpu.CompilerParams(
            dimension_semantics=("parallel",),      # both v7x TCs take batch tiles
            vmem_limit_bytes=32 * 1024 * 1024,      # explicit budget; tiny usage anyway
        ),
    )(xt, w_pair, w_lin, bias)

    return out[0, :B].reshape(B, 1)


def feature_interaction_net(x, interaction_weight, fc_w, fc_b, *, b_tile=512):
    """x: (B, N) f32.  interaction_weight: (N, N).  fc_w: (1, N + N*(N-1)//2).  fc_b: (1,)."""
    w_pair, w_lin, bias = prepare_params(interaction_weight, fc_w, fc_b)
    return _fin_forward(x, w_pair, w_lin, bias, b_tile=b_tile)


def reference_forward(x, interaction_weight, fc_w, fc_b):
    """Pure-JAX transcription of the PyTorch forward (for correctness check)."""
    B, N = x.shape
    inter = x[:, :, None] * x[:, None, :]                  # bmm(x.unsqueeze(2), x.unsqueeze(1))
    inter = inter.reshape(B, -1)
    iu, ju = jnp.triu_indices(N, k=1)
    inter = inter[:, iu * N + ju]
    weighted = inter * interaction_weight[iu, ju]
    combined = jnp.concatenate([x, weighted], axis=1)
    return combined @ fc_w.T + fc_b                         # (B, 1)


if __name__ == "__main__":
    INPUT_SIZE = 8            # n features
    BATCH = 300               # exercises multiple lane-dense tiles + a padded edge tile
    N_PAIR = INPUT_SIZE * (INPUT_SIZE - 1) // 2
    FC_IN = INPUT_SIZE + N_PAIR

    key = jax.random.PRNGKey(0)
    k_x, k_int, k_fcw, k_fcb = jax.random.split(key, 4)

    x = jax.random.normal(k_x, (BATCH, INPUT_SIZE), dtype=jnp.float32)
    interaction_weight = jax.random.normal(k_int, (INPUT_SIZE, INPUT_SIZE), dtype=jnp.float32)
    bound = 1.0 / np.sqrt(FC_IN)
    fc_w = jax.random.uniform(k_fcw, (1, FC_IN), minval=-bound, maxval=bound, dtype=jnp.float32)
    fc_b = jax.random.uniform(k_fcb, (1,), minval=-bound, maxval=bound, dtype=jnp.float32)

    out = feature_interaction_net(x, interaction_weight, fc_w, fc_b, b_tile=128)
    out = jax.block_until_ready(out)

    ref = reference_forward(x, interaction_weight, fc_w, fc_b)
    np.testing.assert_allclose(np.asarray(out), np.asarray(ref), rtol=1e-5, atol=1e-5)

    print("KERNEL_OK")
</pallas_src>

<mosaic_0001>
module attributes {stable_mosaic.version = 11 : i64} {
  func.func @fin_kernel(%arg0: i32, %arg1: memref<8x128xf32, #tpu.memory_space<vmem>>, %arg2: memref<8x8xf32, #tpu.memory_space<vmem>>, %arg3: memref<8x1xf32, #tpu.memory_space<vmem>>, %arg4: memref<1xf32, #tpu.memory_space<smem>>, %arg5: memref<1x128xf32, #tpu.memory_space<vmem>>) attributes {dimension_semantics = [#tpu.dimension_semantics<parallel>], iteration_bounds = array<i64: 3>, scalar_prefetch = 0 : i64, scratch_operands = 0 : i64, tpu.core_type = #tpu.core_type<tc>, window_params = [{transform_indices = @transform_0, window_bounds = array<i64: 8, 128>}, {pipeline_mode = #tpu.pipeline_mode<synchronous>, transform_indices = @transform_1, window_bounds = array<i64: 8, 8>}, {pipeline_mode = #tpu.pipeline_mode<synchronous>, transform_indices = @transform_2, window_bounds = array<i64: 8, 1>}, {transform_indices = @transform_3, window_bounds = array<i64: 1>}, {transform_indices = @transform_4, window_bounds = array<i64: 1, 128>}]} {
    %c0 = arith.constant 0 : index
    %c0_0 = arith.constant 0 : index
    %0 = vector.load %arg1[%c0, %c0_0] : memref<8x128xf32, #tpu.memory_space<vmem>>, vector<8x128xf32>
    %c0_1 = arith.constant 0 : index
    %c0_2 = arith.constant 0 : index
    %1 = vector.load %arg2[%c0_1, %c0_2] : memref<8x8xf32, #tpu.memory_space<vmem>>, vector<8x8xf32>
    %cst = arith.constant dense<0.000000e+00> : vector<8x128xf32>
    %2 = tpu.matmul %1, %0, %cst {dimension_numbers = #tpu.dot_dimension_numbers<[1], [0], [0], [1], [0, 0, 1, 1], [], []>} : vector<8x8xf32>, vector<8x128xf32>, vector<8x128xf32> -> vector<8x128xf32>
    %c0_3 = arith.constant 0 : index
    %c0_4 = arith.constant 0 : index
    %3 = vector.load %arg3[%c0_3, %c0_4] : memref<8x1xf32, #tpu.memory_space<vmem>>, vector<8x1xf32>
    %4 = vector.broadcast %3 : vector<8x1xf32> to vector<8x128xf32>
    %5 = arith.addf %2, %4 : vector<8x128xf32>
    %6 = arith.mulf %0, %5 : vector<8x128xf32>
    %cst_5 = arith.constant dense<0.000000e+00> : vector<128xf32>
    %7 = vector.multi_reduction <add>, %6, %cst_5 [0] : vector<8x128xf32> to vector<128xf32>
    %8 = vector.shape_cast %7 : vector<128xf32> to vector<1x128xf32>
    %c0_6 = arith.constant 0 : index
    %9 = memref.load %arg4[%c0_6] : memref<1xf32, #tpu.memory_space<smem>>
    %10 = vector.broadcast %9 : f32 to vector<1x128xf32>
    %11 = arith.addf %8, %10 : vector<1x128xf32>
    %c0_7 = arith.constant 0 : index
    %c0_8 = arith.constant 0 : index
    %12 = vector.load %arg5[%c0_7, %c0_8] : memref<1x128xf32, #tpu.memory_space<vmem>>, vector<1x128xf32>
    tpu.vector_store %arg5[%c0_7, %c0_8], %11 {strides = array<i32>} : memref<1x128xf32, #tpu.memory_space<vmem>>, vector<1x128xf32>,
    return
  }
  func.func @transform_0(%arg0: i32) -> (i32, i32) {
    %c0_i32 = arith.constant 0 : i32
    %c0_i32_0 = arith.constant 0 : i32
    return %c0_i32, %arg0 : i32, i32
  }
  func.func @transform_1(%arg0: i32) -> (i32, i32) {
    %c0_i32 = arith.constant 0 : i32
    %c0_i32_0 = arith.constant 0 : i32
    %c0_i32_1 = arith.constant 0 : i32
    return %c0_i32, %c0_i32_0 : i32, i32
  }
  func.func @transform_2(%arg0: i32) -> (i32, i32) {
    %c0_i32 = arith.constant 0 : i32
    %c0_i32_0 = arith.constant 0 : i32
    %c0_i32_1 = arith.constant 0 : i32
    return %c0_i32, %c0_i32_0 : i32, i32
  }
  func.func @transform_3(%arg0: i32) -> i32 {
    %c0_i32 = arith.constant 0 : i32
    %c0_i32_0 = arith.constant 0 : i32
    return %c0_i32 : i32
  }
  func.func @transform_4(%arg0: i32) -> (i32, i32) {
    %c0_i32 = arith.constant 0 : i32
    %c0_i32_0 = arith.constant 0 : i32
    return %c0_i32, %arg0 : i32, i32
  }
}

</mosaic_0001>

<bundles_post_ra>
// kernel: _fin_forward.1
= control target key start
LH: loop header
LB: loop body
LE: loop exit
PB: predicated region body
PF: predicated region fallthrough
CT: control target
= control target key end

     0   :  { %s338_s17 = smov 0   ;;  %s361_s0 = inlined_call_operand.vmem [shape: f32[8,384], index: 0, kind: input, shape index: {}]   ;;  %s362_s1 = inlined_call_operand.vmem [shape: f32[8,8], index: 1, kind: input, shape index: {}]   ;;  %s363_s2 = inlined_call_operand.vmem [shape: f32[8,1], index: 2, kind: input, shape index: {}]   ;;  %s364_s3 = inlined_call_operand.<no memory space> [shape: f32[1], index: 3, kind: input, shape index: {}]   ;;  %s365_s4 = inlined_call_operand.vmem [shape: f32[1,384], index: 4, kind: output, shape index: {}]  }
   0x1   :  { %9 = sst [smem:[#allocation2]] %s364_s3 }
   0x2 LB: > { %s282_s18 = sadd.s32 4294967295, %s307_s17   ;;  %p286_p0 = scmp.ge.s32.totalorder %s307_s17, 1  ;;  %s307_s17 = sphi %s338_s17, %s15_s17  }
   0x3   : > { %p162_p1 = scmp.lt.s32.totalorder %s307_s17, 4 }
   0x5   : > { %p163_p2 = pnand %p286_p0, %p162_p1 }
   0x6   : > { %p185_p3 = scmp.lt.s32.totalorder (!%p163_p2), %s282_s18, 2  ;;  %s231_s26 = sld [smem:[#allocation2]] (!%p163_p2) }
   0x7   : > { %166 = sbr.rel (%p163_p2) target bundleno = 162 (0xa2), region = 36 }
   0xc   : > { %v194_v0 = vld [vmem:[%s363_s2] sm:$0xff]  ;;  %v309_v1 = vmov 0   ;;  %s367_s18 = smov (!%p185_p3, %s282_s18), 2  ;;  %vm200_vm0 = vcmask 64512   ;;  %v232_v13 = vstv %s231_s26 }
   0xd   : > { %300 = vset.pattern.permute.xlu0 %v309_v1  ;;  %s287_s3 = sshll.u32 %s367_s18, 3  ;;  %v193_v2 = vld [vmem:[%s362_s1] sm:$0xff]  ;;  %s191_s29 = scalar_lea.vmem %s365_s4, %s367_s18 }
   0xe   : > { %197 = vperm.xlu0 %300, %v194_v0   ;;  %s188_s23 = scalar_lea.vmem %s361_s0, %s287_s3 }
   0xf   : > { %v192_v3 = vld [vmem:[%s188_s23] sm:$0xff] }
  0x10   : > { %219 = vmatpush.msra.mxu0 %v192_v3 }
  0x11   : > { %288 = vmatmul.msk.f32.vlgmr.msra.gmra.mxu0 %vm200_vm0, %v193_v2 }
  0x80   : > { %v198_v4 = vpop.permute.xlu0 %197 }
  0x8e   : > { %v221_v5 = vpop.f32.mrf.mxu0 }
  0x8f   : > { %v222_v6 = vadd.f32 %v221_v5, %v198_v4 }
  0x91   : > { %v224_v7 = vmul.f32 %v222_v6, %v192_v3 }
  0x93   : > { %v225_v8 = vrot.slane %v224_v7, 4 }
  0x95   : > { %v226_v9 = vadd.f32 %v225_v8, %v224_v7 }
  0x97   : > { %v227_v10 = vrot.slane %v226_v9, 2 }
  0x99   : > { %v228_v11 = vadd.f32 %v227_v10, %v226_v9 }
  0x9b   : > { %v229_v12 = vrot.slane %v228_v11, 1 }
  0x9d   : > { %v230_v14 = vadd.f32 %v229_v12, %v228_v11 }
  0x9f   : > { %v233_v15 = vadd.f32 %v232_v13, %v230_v14 }
  0xa1   : > { %234 = vst [vmem:[%s191_s29] sm:$0x1] %v233_v15 }
  0xa2 PF: > { %s15_s17 = sadd.s32 1, %s307_s17  }
  0xa3   : > { %p12_p4 = scmp.ge.s32.totalorder %s15_s17, 5  }
  0xa5   :  { %14 = sbr.rel (!%p12_p4) target bundleno = 2 (0x2), region = 66 }

</bundles_post_ra>
